<compile_context>
chip_gen: v6e
topology: v6e:2x2x1
jax: 0.10.0
libtpu: 0.0.40
codegen_flags: <defaults>
</compile_context>

<pallas_src>
import jax
import jax.numpy as jnp
import numpy as np
from jax import lax
from jax.experimental import pallas as pl
from jax.experimental.pallas import tpu as pltpu

EPS = 1e-5        # nn.InstanceNorm2d default eps (affine=False)
NEG_SLOPE = 0.2   # LeakyReLU negative slope


# ------------------------------- Pallas kernel --------------------------------

def _make_resblock_kernel(Nb, C, H, W, compute_dtype, fuse_taps):
    HW = H * W

    def lane_roll(a, shift):
        # result[:, p] = a[:, p - shift]  (np.roll semantics); static shift >= 0.
        return pltpu.roll(a, shift % HW, axis=1)

    def taps9(a, masks):
        # Nine taps of the reflection-padded 3x3 window, entirely as lane
        # shifts + boundary selects in the lane-dense (C, HW) layout.
        col0, colW, row0, rowH = masks
        am1, ap1 = lane_roll(a, 1), lane_roll(a, -1)
        left = jnp.where(col0, ap1, am1)          # a(y, reflect(x-1))
        right = jnp.where(colW, am1, ap1)         # a(y, reflect(x+1))

        def vpair(b):
            bmW, bpW = lane_roll(b, W), lane_roll(b, -W)
            up = jnp.where(row0, bpW, bmW)        # b(reflect(y-1), x)
            down = jnp.where(rowH, bmW, bpW)      # b(reflect(y+1), x)
            return up, down

        ul, dl = vpair(left)
        um, dm = vpair(a)
        ur, dr = vpair(right)
        return [ul, um, ur, left, a, right, dl, dm, dr]   # k = 3*dy + dx

    def conv3x3_refl(y, w_ref, masks):
        taps = taps9(y.astype(compute_dtype), masks)
        if fuse_taps:
            # One deep-K MXU matmul: (C, 9C) @ (9C, HW).
            im2col = jnp.concatenate(taps, axis=0)
            return jnp.dot(w_ref[...], im2col, preferred_element_type=jnp.float32)
        # Tiny / sublane-unaligned C: 9 accumulated (C,C)@(C,HW) dots.
        acc = jnp.zeros((C, HW), jnp.float32)
        for k in range(9):
            acc = acc + jnp.dot(w_ref[k], taps[k], preferred_element_type=jnp.float32)
        return acc

    def instance_norm(y):
        # Centered two-pass biased mean/variance over the lane (spatial) axis.
        mean = jnp.mean(y, axis=1, keepdims=True)
        yc = y - mean
        var = jnp.mean(yc * yc, axis=1, keepdims=True)
        return yc * lax.rsqrt(var + EPS)

    def kernel(x_ref, w1_ref, w2_ref, coords_ref, o_ref):
        col = coords_ref[0:1, :]                      # (1, HW) int32
        row = coords_ref[1:2, :]
        masks = (col == 0, col == W - 1, row == 0, row == H - 1)
        for n in range(Nb):                           # static unroll: Nb samples / step
            x = x_ref[n].astype(jnp.float32)          # (C, HW), lane-dense
            y = instance_norm(conv3x3_refl(x, w1_ref, masks))
            y = jnp.where(y > 0, y, NEG_SLOPE * y)    # LeakyReLU(0.2)
            y = instance_norm(conv3x3_refl(y, w2_ref, masks))
            o_ref[n] = (x + y).astype(o_ref.dtype)    # residual add

    return kernel


# --------------------------------- wrapper ------------------------------------

def resblock(x_nchw, w1, b1, w2, b2, *, compute_dtype=None, nb=None):
    """ResBlock forward.  x: (N,C,H,W) f32.  w*: (C,C,3,3) PyTorch OIHW.  b*: (C,).

    b1/b2 are accepted for API parity but not used by the kernel: a per-channel
    constant added before InstanceNorm2d(affine=False) is exactly cancelled by
    the mean subtraction, so dropping it does not change the forward result.
    """
    N, C, H, W = x_nchw.shape
    HW = H * W
    if compute_dtype is None:
        compute_dtype = jnp.bfloat16 if C >= 128 else jnp.float32
    cbytes = jnp.dtype(compute_dtype).itemsize
    xbytes = jnp.dtype(x_nchw.dtype).itemsize
    fuse_taps = (C % 8 == 0)      # sublane-aligned im2col stacking

    # Weights: OIHW -> lane-dense matmul layouts (tap index k = 3*dy + dx).
    if fuse_taps:
        w1m = jnp.transpose(w1, (0, 2, 3, 1)).reshape(C, 9 * C).astype(compute_dtype)
        w2m = jnp.transpose(w2, (0, 2, 3, 1)).reshape(C, 9 * C).astype(compute_dtype)
        w_block = (C, 9 * C)
    else:
        w1m = jnp.transpose(w1, (2, 3, 0, 1)).reshape(9, C, C).astype(compute_dtype)
        w2m = jnp.transpose(w2, (2, 3, 0, 1)).reshape(9, C, C).astype(compute_dtype)
        w_block = (9, C, C)

    # Generation-aware VMEM budget (v5e/v6e: 128 MiB, v7x: 64 MiB per TC).
    try:
        vmem_phys = int(pltpu.get_tpu_info().vmem_capacity_bytes)
    except Exception:
        vmem_phys = 64 * 2 ** 20                     # conservative (v7x size)
    vmem_cap = min(100 * 2 ** 20, int(vmem_phys * 0.85))

    def per_step_bytes(nb_):
        io = 2 * 2 * nb_ * C * HW * xbytes           # in+out blocks, double-buffered
        wts = 2 * 2 * 9 * C * C * cbytes             # both weight tensors, double-buffered
        live = C * HW * (18 * cbytes + 16)           # taps + im2col + f32 intermediates
        return io + wts + live + 2 * HW * 4          # + col/row coords

    # Samples per grid step: amortize per-step overhead at small C*HW, but keep
    # >= 2 grid steps so both v7x TensorCores get work.
    if nb is None:
        budget = max(per_step_bytes(1), vmem_cap // 2)
        nb_max = N if N < 2 else max(1, N // 2)
        nb = 1
        for d in range(1, N + 1):
            if N % d == 0 and d <= nb_max and per_step_bytes(d) <= budget:
                nb = d
    if N % nb != 0:
        raise ValueError(f"nb={nb} must divide N={N}")

    # TODO(synk): spatial (HW) tiling with a 1-row conv halo for very large
    # C*H*W (per-sample intermediates > ~50 MiB) so huge images fit v7x VMEM.
    vmem_limit = int(min(vmem_cap, max(32 * 2 ** 20, 2 * per_step_bytes(nb))))

    # Per-position column / row indices used for the reflection boundary
    # selects; computed host-side so the kernel needs no integer div/mod.
    p = np.arange(HW, dtype=np.int32)
    coords = jnp.asarray(np.stack([p % W, p // W]).astype(np.int32))   # (2, HW)

    x2 = x_nchw.reshape(N, C, HW)     # free contiguous merge, stays lane-dense
    kernel = _make_resblock_kernel(nb, C, H, W, compute_dtype, fuse_taps)

    out = pl.pallas_call(
        kernel,
        out_shape=jax.ShapeDtypeStruct((N, C, HW), x_nchw.dtype),
        grid=(N // nb,),
        in_specs=[
            pl.BlockSpec((nb, C, HW), lambda i: (i, 0, 0)),
            pl.BlockSpec(w_block, lambda i: (0,) * len(w_block)),
            pl.BlockSpec(w_block, lambda i: (0,) * len(w_block)),
            pl.BlockSpec((2, HW), lambda i: (0, 0)),
        ],
        out_specs=pl.BlockSpec((nb, C, HW), lambda i: (i, 0, 0)),
        compiler_params=pltpu.CompilerParams(
            dimension_semantics=("parallel",),
            vmem_limit_bytes=vmem_limit,
        ),
    )(x2, w1m, w2m, coords)

    return out.reshape(N, C, H, W)


# ------------------------ numpy (f64) reference --------------------------------

def _ref_resblock_np(x, w1, b1, w2, b2):
    x = np.asarray(x, np.float64)
    w1 = np.asarray(w1, np.float64); b1 = np.asarray(b1, np.float64)
    w2 = np.asarray(w2, np.float64); b2 = np.asarray(b2, np.float64)

    def conv3x3_refl(v, w, b):
        H, W = v.shape[2], v.shape[3]
        pad = np.pad(v, ((0, 0), (0, 0), (1, 1), (1, 1)), mode="reflect")
        out = np.zeros_like(v)
        for dy in range(3):
            for dx in range(3):
                out += np.einsum("oi,nihw->nohw", w[:, :, dy, dx],
                                 pad[:, :, dy:dy + H, dx:dx + W])
        return out + b[None, :, None, None]

    def inorm(y):
        m = y.mean(axis=(2, 3), keepdims=True)
        v = ((y - m) ** 2).mean(axis=(2, 3), keepdims=True)
        return (y - m) / np.sqrt(v + EPS)

    y = inorm(conv3x3_refl(x, w1, b1))
    y = np.where(y > 0.0, y, NEG_SLOPE * y)
    y = inorm(conv3x3_refl(y, w2, b2))
    return x + y


# ----------------------------------- main --------------------------------------

if __name__ == "__main__":
    key = jax.random.PRNGKey(0)

    # Main check: module's natural small shapes (unfused-tap path, nb auto -> 1).
    N, C, H, W = 2, 4, 16, 16
    kx, k1, k2, k3, k4, k5 = jax.random.split(key, 6)
    bound = 1.0 / np.sqrt(C * 9)
    x = jax.random.normal(kx, (N, C, H, W), jnp.float32)
    w1 = jax.random.uniform(k1, (C, C, 3, 3), jnp.float32, -bound, bound)
    b1 = jax.random.uniform(k2, (C,), jnp.float32, -bound, bound)
    w2 = jax.random.uniform(k3, (C, C, 3, 3), jnp.float32, -bound, bound)
    b2 = jax.random.uniform(k4, (C,), jnp.float32, -bound, bound)

    out = jax.block_until_ready(jax.jit(resblock)(x, w1, b1, w2, b2))
    ref = _ref_resblock_np(x, w1, b1, w2, b2)
    np.testing.assert_allclose(np.asarray(out), ref, rtol=1e-4, atol=1e-4)

    # Secondary check: exercises the fused deep-K im2col matmul (C % 8 == 0)
    # and multi-sample-per-grid-step batching (nb=4 -> 2 parallel grid steps).
    N2, C2 = 8, 8
    kx2, k6, k7, k8, k9 = jax.random.split(k5, 5)
    bound2 = 1.0 / np.sqrt(C2 * 9)
    x2 = jax.random.normal(kx2, (N2, C2, H, W), jnp.float32)
    w1b = jax.random.uniform(k6, (C2, C2, 3, 3), jnp.float32, -bound2, bound2)
    b1b = jax.random.uniform(k7, (C2,), jnp.float32, -bound2, bound2)
    w2b = jax.random.uniform(k8, (C2, C2, 3, 3), jnp.float32, -bound2, bound2)
    b2b = jax.random.uniform(k9, (C2,), jnp.float32, -bound2, bound2)
    out2 = jax.block_until_ready(resblock(x2, w1b, b1b, w2b, b2b, nb=4))
    ref2 = _ref_resblock_np(x2, w1b, b1b, w2b, b2b)
    np.testing.assert_allclose(np.asarray(out2), ref2, rtol=1e-4, atol=1e-4)

    print("KERNEL_OK")
</pallas_src>

<mosaic_0001>
module attributes {stable_mosaic.version = 11 : i64} {
  func.func @kernel(%arg0: i32, %arg1: memref<1x4x256xf32, #tpu.memory_space<vmem>>, %arg2: memref<9x4x4xf32, #tpu.memory_space<vmem>>, %arg3: memref<9x4x4xf32, #tpu.memory_space<vmem>>, %arg4: memref<2x256xi32, #tpu.memory_space<vmem>>, %arg5: memref<1x4x256xf32, #tpu.memory_space<vmem>>) attributes {dimension_semantics = [#tpu.dimension_semantics<parallel>], iteration_bounds = array<i64: 2>, scalar_prefetch = 0 : i64, scratch_operands = 0 : i64, tpu.core_type = #tpu.core_type<tc>, window_params = [{transform_indices = @transform_0, window_bounds = array<i64: 1, 4, 256>}, {pipeline_mode = #tpu.pipeline_mode<synchronous>, transform_indices = @transform_1, window_bounds = array<i64: 9, 4, 4>}, {pipeline_mode = #tpu.pipeline_mode<synchronous>, transform_indices = @transform_2, window_bounds = array<i64: 9, 4, 4>}, {pipeline_mode = #tpu.pipeline_mode<synchronous>, transform_indices = @transform_3, window_bounds = array<i64: 2, 256>}, {transform_indices = @transform_4, window_bounds = array<i64: 1, 4, 256>}]} {
    %c0 = arith.constant 0 : index
    %c0_0 = arith.constant 0 : index
    %0 = vector.load %arg4[%c0, %c0_0] : memref<2x256xi32, #tpu.memory_space<vmem>>, vector<1x256xi32>
    %c1 = arith.constant 1 : index
    %c0_1 = arith.constant 0 : index
    %1 = vector.load %arg4[%c1, %c0_1] : memref<2x256xi32, #tpu.memory_space<vmem>>, vector<1x256xi32>
    %c0_i32 = arith.constant 0 : i32
    %2 = vector.broadcast %c0_i32 : i32 to vector<1x256xi32>
    %3 = arith.cmpi eq, %0, %2 : vector<1x256xi32>
    %c15_i32 = arith.constant 15 : i32
    %4 = vector.broadcast %c15_i32 : i32 to vector<1x256xi32>
    %5 = arith.cmpi eq, %0, %4 : vector<1x256xi32>
    %c0_i32_2 = arith.constant 0 : i32
    %6 = vector.broadcast %c0_i32_2 : i32 to vector<1x256xi32>
    %7 = arith.cmpi eq, %1, %6 : vector<1x256xi32>
    %c15_i32_3 = arith.constant 15 : i32
    %8 = vector.broadcast %c15_i32_3 : i32 to vector<1x256xi32>
    %9 = arith.cmpi eq, %1, %8 : vector<1x256xi32>
    %c0_4 = arith.constant 0 : index
    %c0_5 = arith.constant 0 : index
    %c0_6 = arith.constant 0 : index
    %10 = vector.load %arg1[%c0_4, %c0_5, %c0_6] : memref<1x4x256xf32, #tpu.memory_space<vmem>>, vector<1x4x256xf32>
    %11 = vector.shape_cast %10 : vector<1x4x256xf32> to vector<4x256xf32>
    %c1_i32 = arith.constant 1 : i32
    %12 = tpu.dynamic_rotate %11 by %c1_i32 dim 1 : vector<4x256xf32>, i32 -> vector<4x256xf32>
    %c255_i32 = arith.constant 255 : i32
    %13 = tpu.dynamic_rotate %11 by %c255_i32 dim 1 : vector<4x256xf32>, i32 -> vector<4x256xf32>
    %14 = vector.shape_cast %3 : vector<1x256xi1> to vector<1x256xi1>
    %15 = vector.broadcast %14 : vector<1x256xi1> to vector<4x256xi1>
    %16 = arith.select %15, %13, %12 : vector<4x256xi1>, vector<4x256xf32>
    %17 = vector.shape_cast %5 : vector<1x256xi1> to vector<1x256xi1>
    %18 = vector.broadcast %17 : vector<1x256xi1> to vector<4x256xi1>
    %19 = arith.select %18, %12, %13 : vector<4x256xi1>, vector<4x256xf32>
    %c16_i32 = arith.constant 16 : i32
    %20 = tpu.dynamic_rotate %16 by %c16_i32 dim 1 : vector<4x256xf32>, i32 -> vector<4x256xf32>
    %c240_i32 = arith.constant 240 : i32
    %21 = tpu.dynamic_rotate %16 by %c240_i32 dim 1 : vector<4x256xf32>, i32 -> vector<4x256xf32>
    %22 = vector.shape_cast %7 : vector<1x256xi1> to vector<1x256xi1>
    %23 = vector.broadcast %22 : vector<1x256xi1> to vector<4x256xi1>
    %24 = arith.select %23, %21, %20 : vector<4x256xi1>, vector<4x256xf32>
    %25 = vector.shape_cast %9 : vector<1x256xi1> to vector<1x256xi1>
    %26 = vector.broadcast %25 : vector<1x256xi1> to vector<4x256xi1>
    %27 = arith.select %26, %20, %21 : vector<4x256xi1>, vector<4x256xf32>
    %c16_i32_7 = arith.constant 16 : i32
    %28 = tpu.dynamic_rotate %11 by %c16_i32_7 dim 1 : vector<4x256xf32>, i32 -> vector<4x256xf32>
    %c240_i32_8 = arith.constant 240 : i32
    %29 = tpu.dynamic_rotate %11 by %c240_i32_8 dim 1 : vector<4x256xf32>, i32 -> vector<4x256xf32>
    %30 = vector.shape_cast %7 : vector<1x256xi1> to vector<1x256xi1>
    %31 = vector.broadcast %30 : vector<1x256xi1> to vector<4x256xi1>
    %32 = arith.select %31, %29, %28 : vector<4x256xi1>, vector<4x256xf32>
    %33 = vector.shape_cast %9 : vector<1x256xi1> to vector<1x256xi1>
    %34 = vector.broadcast %33 : vector<1x256xi1> to vector<4x256xi1>
    %35 = arith.select %34, %28, %29 : vector<4x256xi1>, vector<4x256xf32>
    %c16_i32_9 = arith.constant 16 : i32
    %36 = tpu.dynamic_rotate %19 by %c16_i32_9 dim 1 : vector<4x256xf32>, i32 -> vector<4x256xf32>
    %c240_i32_10 = arith.constant 240 : i32
    %37 = tpu.dynamic_rotate %19 by %c240_i32_10 dim 1 : vector<4x256xf32>, i32 -> vector<4x256xf32>
    %38 = vector.shape_cast %7 : vector<1x256xi1> to vector<1x256xi1>
    %39 = vector.broadcast %38 : vector<1x256xi1> to vector<4x256xi1>
    %40 = arith.select %39, %37, %36 : vector<4x256xi1>, vector<4x256xf32>
    %41 = vector.shape_cast %9 : vector<1x256xi1> to vector<1x256xi1>
    %42 = vector.broadcast %41 : vector<1x256xi1> to vector<4x256xi1>
    %43 = arith.select %42, %36, %37 : vector<4x256xi1>, vector<4x256xf32>
    %cst = arith.constant 0.000000e+00 : f32
    %44 = vector.broadcast %cst : f32 to vector<4x256xf32>
    %c0_11 = arith.constant 0 : index
    %c0_12 = arith.constant 0 : index
    %c0_13 = arith.constant 0 : index
    %45 = vector.load %arg2[%c0_11, %c0_12, %c0_13] : memref<9x4x4xf32, #tpu.memory_space<vmem>>, vector<1x4x4xf32>
    %46 = vector.shape_cast %45 : vector<1x4x4xf32> to vector<4x4xf32>
    %cst_14 = arith.constant dense<0.000000e+00> : vector<4x256xf32>
    %47 = tpu.matmul %46, %24, %cst_14 {dimension_numbers = #tpu.dot_dimension_numbers<[1], [0], [0], [1], [0, 0, 1, 1], [], []>} : vector<4x4xf32>, vector<4x256xf32>, vector<4x256xf32> -> vector<4x256xf32>
    %48 = arith.addf %44, %47 : vector<4x256xf32>
    %c1_15 = arith.constant 1 : index
    %c0_16 = arith.constant 0 : index
    %c0_17 = arith.constant 0 : index
    %49 = vector.load %arg2[%c1_15, %c0_16, %c0_17] : memref<9x4x4xf32, #tpu.memory_space<vmem>>, vector<1x4x4xf32>
    %50 = vector.shape_cast %49 : vector<1x4x4xf32> to vector<4x4xf32>
    %cst_18 = arith.constant dense<0.000000e+00> : vector<4x256xf32>
    %51 = tpu.matmul %50, %32, %cst_18 {dimension_numbers = #tpu.dot_dimension_numbers<[1], [0], [0], [1], [0, 0, 1, 1], [], []>} : vector<4x4xf32>, vector<4x256xf32>, vector<4x256xf32> -> vector<4x256xf32>
    %52 = arith.addf %48, %51 : vector<4x256xf32>
    %c2 = arith.constant 2 : index
    %c0_19 = arith.constant 0 : index
    %c0_20 = arith.constant 0 : index
    %53 = vector.load %arg2[%c2, %c0_19, %c0_20] : memref<9x4x4xf32, #tpu.memory_space<vmem>>, vector<1x4x4xf32>
    %54 = vector.shape_cast %53 : vector<1x4x4xf32> to vector<4x4xf32>
    %cst_21 = arith.constant dense<0.000000e+00> : vector<4x256xf32>
    %55 = tpu.matmul %54, %40, %cst_21 {dimension_numbers = #tpu.dot_dimension_numbers<[1], [0], [0], [1], [0, 0, 1, 1], [], []>} : vector<4x4xf32>, vector<4x256xf32>, vector<4x256xf32> -> vector<4x256xf32>
    %56 = arith.addf %52, %55 : vector<4x256xf32>
    %c3 = arith.constant 3 : index
    %c0_22 = arith.constant 0 : index
    %c0_23 = arith.constant 0 : index
    %57 = vector.load %arg2[%c3, %c0_22, %c0_23] : memref<9x4x4xf32, #tpu.memory_space<vmem>>, vector<1x4x4xf32>
    %58 = vector.shape_cast %57 : vector<1x4x4xf32> to vector<4x4xf32>
    %cst_24 = arith.constant dense<0.000000e+00> : vector<4x256xf32>
    %59 = tpu.matmul %58, %16, %cst_24 {dimension_numbers = #tpu.dot_dimension_numbers<[1], [0], [0], [1], [0, 0, 1, 1], [], []>} : vector<4x4xf32>, vector<4x256xf32>, vector<4x256xf32> -> vector<4x256xf32>
    %60 = arith.addf %56, %59 : vector<4x256xf32>
    %c4 = arith.constant 4 : index
    %c0_25 = arith.constant 0 : index
    %c0_26 = arith.constant 0 : index
    %61 = vector.load %arg2[%c4, %c0_25, %c0_26] : memref<9x4x4xf32, #tpu.memory_space<vmem>>, vector<1x4x4xf32>
    %62 = vector.shape_cast %61 : vector<1x4x4xf32> to vector<4x4xf32>
    %cst_27 = arith.constant dense<0.000000e+00> : vector<4x256xf32>
    %63 = tpu.matmul %62, %11, %cst_27 {dimension_numbers = #tpu.dot_dimension_numbers<[1], [0], [0], [1], [0, 0, 1, 1], [], []>} : vector<4x4xf32>, vector<4x256xf32>, vector<4x256xf32> -> vector<4x256xf32>
    %64 = arith.addf %60, %63 : vector<4x256xf32>
    %c5 = arith.constant 5 : index
    %c0_28 = arith.constant 0 : index
    %c0_29 = arith.constant 0 : index
    %65 = vector.load %arg2[%c5, %c0_28, %c0_29] : memref<9x4x4xf32, #tpu.memory_space<vmem>>, vector<1x4x4xf32>
    %66 = vector.shape_cast %65 : vector<1x4x4xf32> to vector<4x4xf32>
    %cst_30 = arith.constant dense<0.000000e+00> : vector<4x256xf32>
    %67 = tpu.matmul %66, %19, %cst_30 {dimension_numbers = #tpu.dot_dimension_numbers<[1], [0], [0], [1], [0, 0, 1, 1], [], []>} : vector<4x4xf32>, vector<4x256xf32>, vector<4x256xf32> -> vector<4x256xf32>
    %68 = arith.addf %64, %67 : vector<4x256xf32>
    %c6 = arith.constant 6 : index
    %c0_31 = arith.constant 0 : index
    %c0_32 = arith.constant 0 : index
    %69 = vector.load %arg2[%c6, %c0_31, %c0_32] : memref<9x4x4xf32, #tpu.memory_space<vmem>>, vector<1x4x4xf32>
    %70 = vector.shape_cast %69 : vector<1x4x4xf32> to vector<4x4xf32>
    %cst_33 = arith.constant dense<0.000000e+00> : vector<4x256xf32>
    %71 = tpu.matmul %70, %27, %cst_33 {dimension_numbers = #tpu.dot_dimension_numbers<[1], [0], [0], [1], [0, 0, 1, 1], [], []>} : vector<4x4xf32>, vector<4x256xf32>, vector<4x256xf32> -> vector<4x256xf32>
    %72 = arith.addf %68, %71 : vector<4x256xf32>
    %c7 = arith.constant 7 : index
    %c0_34 = arith.constant 0 : index
    %c0_35 = arith.constant 0 : index
    %73 = vector.load %arg2[%c7, %c0_34, %c0_35] : memref<9x4x4xf32, #tpu.memory_space<vmem>>, vector<1x4x4xf32>
    %74 = vector.shape_cast %73 : vector<1x4x4xf32> to vector<4x4xf32>
    %cst_36 = arith.constant dense<0.000000e+00> : vector<4x256xf32>
    %75 = tpu.matmul %74, %35, %cst_36 {dimension_numbers = #tpu.dot_dimension_numbers<[1], [0], [0], [1], [0, 0, 1, 1], [], []>} : vector<4x4xf32>, vector<4x256xf32>, vector<4x256xf32> -> vector<4x256xf32>
    %76 = arith.addf %72, %75 : vector<4x256xf32>
    %c8 = arith.constant 8 : index
    %c0_37 = arith.constant 0 : index
    %c0_38 = arith.constant 0 : index
    %77 = vector.load %arg2[%c8, %c0_37, %c0_38] : memref<9x4x4xf32, #tpu.memory_space<vmem>>, vector<1x4x4xf32>
    %78 = vector.shape_cast %77 : vector<1x4x4xf32> to vector<4x4xf32>
    %cst_39 = arith.constant dense<0.000000e+00> : vector<4x256xf32>
    %79 = tpu.matmul %78, %43, %cst_39 {dimension_numbers = #tpu.dot_dimension_numbers<[1], [0], [0], [1], [0, 0, 1, 1], [], []>} : vector<4x4xf32>, vector<4x256xf32>, vector<4x256xf32> -> vector<4x256xf32>
    %80 = arith.addf %76, %79 : vector<4x256xf32>
    %cst_40 = arith.constant dense<0.000000e+00> : vector<4xf32>
    %81 = vector.multi_reduction <add>, %80, %cst_40 [1] : vector<4x256xf32> to vector<4xf32>
    %82 = vector.shape_cast %81 : vector<4xf32> to vector<4x1xf32>
    %cst_41 = arith.constant 2.560000e+02 : f32
    %83 = vector.broadcast %cst_41 : f32 to vector<4x1xf32>
    %84 = arith.divf %82, %83 : vector<4x1xf32>
    %85 = vector.broadcast %84 : vector<4x1xf32> to vector<4x256xf32>
    %86 = arith.subf %80, %85 : vector<4x256xf32>
    %87 = arith.mulf %86, %86 : vector<4x256xf32>
    %cst_42 = arith.constant dense<0.000000e+00> : vector<4xf32>
    %88 = vector.multi_reduction <add>, %87, %cst_42 [1] : vector<4x256xf32> to vector<4xf32>
    %89 = vector.shape_cast %88 : vector<4xf32> to vector<4x1xf32>
    %cst_43 = arith.constant 2.560000e+02 : f32
    %90 = vector.broadcast %cst_43 : f32 to vector<4x1xf32>
    %91 = arith.divf %89, %90 : vector<4x1xf32>
    %cst_44 = arith.constant 9.99999974E-6 : f32
    %92 = vector.broadcast %cst_44 : f32 to vector<4x1xf32>
    %93 = arith.addf %91, %92 : vector<4x1xf32>
    %94 = math.rsqrt %93 : vector<4x1xf32>
    %95 = vector.broadcast %94 : vector<4x1xf32> to vector<4x256xf32>
    %96 = arith.mulf %86, %95 : vector<4x256xf32>
    %cst_45 = arith.constant 0.000000e+00 : f32
    %97 = vector.broadcast %cst_45 : f32 to vector<4x256xf32>
    %98 = arith.cmpf ogt, %96, %97 : vector<4x256xf32>
    %cst_46 = arith.constant 2.000000e-01 : f32
    %99 = vector.broadcast %cst_46 : f32 to vector<4x256xf32>
    %100 = arith.mulf %99, %96 : vector<4x256xf32>
    %101 = arith.select %98, %96, %100 : vector<4x256xi1>, vector<4x256xf32>
    %c1_i32_47 = arith.constant 1 : i32
    %102 = tpu.dynamic_rotate %101 by %c1_i32_47 dim 1 : vector<4x256xf32>, i32 -> vector<4x256xf32>
    %c255_i32_48 = arith.constant 255 : i32
    %103 = tpu.dynamic_rotate %101 by %c255_i32_48 dim 1 : vector<4x256xf32>, i32 -> vector<4x256xf32>
    %104 = vector.shape_cast %3 : vector<1x256xi1> to vector<1x256xi1>
    %105 = vector.broadcast %104 : vector<1x256xi1> to vector<4x256xi1>
    %106 = arith.select %105, %103, %102 : vector<4x256xi1>, vector<4x256xf32>
    %107 = vector.shape_cast %5 : vector<1x256xi1> to vector<1x256xi1>
    %108 = vector.broadcast %107 : vector<1x256xi1> to vector<4x256xi1>
    %109 = arith.select %108, %102, %103 : vector<4x256xi1>, vector<4x256xf32>
    %c16_i32_49 = arith.constant 16 : i32
    %110 = tpu.dynamic_rotate %106 by %c16_i32_49 dim 1 : vector<4x256xf32>, i32 -> vector<4x256xf32>
    %c240_i32_50 = arith.constant 240 : i32
    %111 = tpu.dynamic_rotate %106 by %c240_i32_50 dim 1 : vector<4x256xf32>, i32 -> vector<4x256xf32>
    %112 = vector.shape_cast %7 : vector<1x256xi1> to vector<1x256xi1>
    %113 = vector.broadcast %112 : vector<1x256xi1> to vector<4x256xi1>
    %114 = arith.select %113, %111, %110 : vector<4x256xi1>, vector<4x256xf32>
    %115 = vector.shape_cast %9 : vector<1x256xi1> to vector<1x256xi1>
    %116 = vector.broadcast %115 : vector<1x256xi1> to vector<4x256xi1>
    %117 = arith.select %116, %110, %111 : vector<4x256xi1>, vector<4x256xf32>
    %c16_i32_51 = arith.constant 16 : i32
    %118 = tpu.dynamic_rotate %101 by %c16_i32_51 dim 1 : vector<4x256xf32>, i32 -> vector<4x256xf32>
    %c240_i32_52 = arith.constant 240 : i32
    %119 = tpu.dynamic_rotate %101 by %c240_i32_52 dim 1 : vector<4x256xf32>, i32 -> vector<4x256xf32>
    %120 = vector.shape_cast %7 : vector<1x256xi1> to vector<1x256xi1>
    %121 = vector.broadcast %120 : vector<1x256xi1> to vector<4x256xi1>
    %122 = arith.select %121, %119, %118 : vector<4x256xi1>, vector<4x256xf32>
    %123 = vector.shape_cast %9 : vector<1x256xi1> to vector<1x256xi1>
    %124 = vector.broadcast %123 : vector<1x256xi1> to vector<4x256xi1>
    %125 = arith.select %124, %118, %119 : vector<4x256xi1>, vector<4x256xf32>
    %c16_i32_53 = arith.constant 16 : i32
    %126 = tpu.dynamic_rotate %109 by %c16_i32_53 dim 1 : vector<4x256xf32>, i32 -> vector<4x256xf32>
    %c240_i32_54 = arith.constant 240 : i32
    %127 = tpu.dynamic_rotate %109 by %c240_i32_54 dim 1 : vector<4x256xf32>, i32 -> vector<4x256xf32>
    %128 = vector.shape_cast %7 : vector<1x256xi1> to vector<1x256xi1>
    %129 = vector.broadcast %128 : vector<1x256xi1> to vector<4x256xi1>
    %130 = arith.select %129, %127, %126 : vector<4x256xi1>, vector<4x256xf32>
    %131 = vector.shape_cast %9 : vector<1x256xi1> to vector<1x256xi1>
    %132 = vector.broadcast %131 : vector<1x256xi1> to vector<4x256xi1>
    %133 = arith.select %132, %126, %127 : vector<4x256xi1>, vector<4x256xf32>
    %cst_55 = arith.constant 0.000000e+00 : f32
    %134 = vector.broadcast %cst_55 : f32 to vector<4x256xf32>
    %c0_56 = arith.constant 0 : index
    %c0_57 = arith.constant 0 : index
    %c0_58 = arith.constant 0 : index
    %135 = vector.load %arg3[%c0_56, %c0_57, %c0_58] : memref<9x4x4xf32, #tpu.memory_space<vmem>>, vector<1x4x4xf32>
    %136 = vector.shape_cast %135 : vector<1x4x4xf32> to vector<4x4xf32>
    %cst_59 = arith.constant dense<0.000000e+00> : vector<4x256xf32>
    %137 = tpu.matmul %136, %114, %cst_59 {dimension_numbers = #tpu.dot_dimension_numbers<[1], [0], [0], [1], [0, 0, 1, 1], [], []>} : vector<4x4xf32>, vector<4x256xf32>, vector<4x256xf32> -> vector<4x256xf32>
    %138 = arith.addf %134, %137 : vector<4x256xf32>
    %c1_60 = arith.constant 1 : index
    %c0_61 = arith.constant 0 : index
    %c0_62 = arith.constant 0 : index
    %139 = vector.load %arg3[%c1_60, %c0_61, %c0_62] : memref<9x4x4xf32, #tpu.memory_space<vmem>>, vector<1x4x4xf32>
    %140 = vector.shape_cast %139 : vector<1x4x4xf32> to vector<4x4xf32>
    %cst_63 = arith.constant dense<0.000000e+00> : vector<4x256xf32>
    %141 = tpu.matmul %140, %122, %cst_63 {dimension_numbers = #tpu.dot_dimension_numbers<[1], [0], [0], [1], [0, 0, 1, 1], [], []>} : vector<4x4xf32>, vector<4x256xf32>, vector<4x256xf32> -> vector<4x256xf32>
    %142 = arith.addf %138, %141 : vector<4x256xf32>
    %c2_64 = arith.constant 2 : index
    %c0_65 = arith.constant 0 : index
    %c0_66 = arith.constant 0 : index
    %143 = vector.load %arg3[%c2_64, %c0_65, %c0_66] : memref<9x4x4xf32, #tpu.memory_space<vmem>>, vector<1x4x4xf32>
    %144 = vector.shape_cast %143 : vector<1x4x4xf32> to vector<4x4xf32>
    %cst_67 = arith.constant dense<0.000000e+00> : vector<4x256xf32>
    %145 = tpu.matmul %144, %130, %cst_67 {dimension_numbers = #tpu.dot_dimension_numbers<[1], [0], [0], [1], [0, 0, 1, 1], [], []>} : vector<4x4xf32>, vector<4x256xf32>, vector<4x256xf32> -> vector<4x256xf32>
    %146 = arith.addf %142, %145 : vector<4x256xf32>
    %c3_68 = arith.constant 3 : index
    %c0_69 = arith.constant 0 : index
    %c0_70 = arith.constant 0 : index
    %147 = vector.load %arg3[%c3_68, %c0_69, %c0_70] : memref<9x4x4xf32, #tpu.memory_space<vmem>>, vector<1x4x4xf32>
    %148 = vector.shape_cast %147 : vector<1x4x4xf32> to vector<4x4xf32>
    %cst_71 = arith.constant dense<0.000000e+00> : vector<4x256xf32>
    %149 = tpu.matmul %148, %106, %cst_71 {dimension_numbers = #tpu.dot_dimension_numbers<[1], [0], [0], [1], [0, 0, 1, 1], [], []>} : vector<4x4xf32>, vector<4x256xf32>, vector<4x256xf32> -> vector<4x256xf32>
    %150 = arith.addf %146, %149 : vector<4x256xf32>
    %c4_72 = arith.constant 4 : index
    %c0_73 = arith.constant 0 : index
    %c0_74 = arith.constant 0 : index
    %151 = vector.load %arg3[%c4_72, %c0_73, %c0_74] : memref<9x4x4xf32, #tpu.memory_space<vmem>>, vector<1x4x4xf32>
    %152 = vector.shape_cast %151 : vector<1x4x4xf32> to vector<4x4xf32>
    %cst_75 = arith.constant dense<0.000000e+00> : vector<4x256xf32>
    %153 = tpu.matmul %152, %101, %cst_75 {dimension_numbers = #tpu.dot_dimension_numbers<[1], [0], [0], [1], [0, 0, 1, 1], [], []>} : vector<4x4xf32>, vector<4x256xf32>, vector<4x256xf32> -> vector<4x256xf32>
    %154 = arith.addf %150, %153 : vector<4x256xf32>
    %c5_76 = arith.constant 5 : index
    %c0_77 = arith.constant 0 : index
    %c0_78 = arith.constant 0 : index
    %155 = vector.load %arg3[%c5_76, %c0_77, %c0_78] : memref<9x4x4xf32, #tpu.memory_space<vmem>>, vector<1x4x4xf32>
    %156 = vector.shape_cast %155 : vector<1x4x4xf32> to vector<4x4xf32>
    %cst_79 = arith.constant dense<0.000000e+00> : vector<4x256xf32>
    %157 = tpu.matmul %156, %109, %cst_79 {dimension_numbers = #tpu.dot_dimension_numbers<[1], [0], [0], [1], [0, 0, 1, 1], [], []>} : vector<4x4xf32>, vector<4x256xf32>, vector<4x256xf32> -> vector<4x256xf32>
    %158 = arith.addf %154, %157 : vector<4x256xf32>
    %c6_80 = arith.constant 6 : index
    %c0_81 = arith.constant 0 : index
    %c0_82 = arith.constant 0 : index
    %159 = vector.load %arg3[%c6_80, %c0_81, %c0_82] : memref<9x4x4xf32, #tpu.memory_space<vmem>>, vector<1x4x4xf32>
    %160 = vector.shape_cast %159 : vector<1x4x4xf32> to vector<4x4xf32>
    %cst_83 = arith.constant dense<0.000000e+00> : vector<4x256xf32>
    %161 = tpu.matmul %160, %117, %cst_83 {dimension_numbers = #tpu.dot_dimension_numbers<[1], [0], [0], [1], [0, 0, 1, 1], [], []>} : vector<4x4xf32>, vector<4x256xf32>, vector<4x256xf32> -> vector<4x256xf32>
    %162 = arith.addf %158, %161 : vector<4x256xf32>
    %c7_84 = arith.constant 7 : index
    %c0_85 = arith.constant 0 : index
    %c0_86 = arith.constant 0 : index
    %163 = vector.load %arg3[%c7_84, %c0_85, %c0_86] : memref<9x4x4xf32, #tpu.memory_space<vmem>>, vector<1x4x4xf32>
    %164 = vector.shape_cast %163 : vector<1x4x4xf32> to vector<4x4xf32>
    %cst_87 = arith.constant dense<0.000000e+00> : vector<4x256xf32>
    %165 = tpu.matmul %164, %125, %cst_87 {dimension_numbers = #tpu.dot_dimension_numbers<[1], [0], [0], [1], [0, 0, 1, 1], [], []>} : vector<4x4xf32>, vector<4x256xf32>, vector<4x256xf32> -> vector<4x256xf32>
    %166 = arith.addf %162, %165 : vector<4x256xf32>
    %c8_88 = arith.constant 8 : index
    %c0_89 = arith.constant 0 : index
    %c0_90 = arith.constant 0 : index
    %167 = vector.load %arg3[%c8_88, %c0_89, %c0_90] : memref<9x4x4xf32, #tpu.memory_space<vmem>>, vector<1x4x4xf32>
    %168 = vector.shape_cast %167 : vector<1x4x4xf32> to vector<4x4xf32>
    %cst_91 = arith.constant dense<0.000000e+00> : vector<4x256xf32>
    %169 = tpu.matmul %168, %133, %cst_91 {dimension_numbers = #tpu.dot_dimension_numbers<[1], [0], [0], [1], [0, 0, 1, 1], [], []>} : vector<4x4xf32>, vector<4x256xf32>, vector<4x256xf32> -> vector<4x256xf32>
    %170 = arith.addf %166, %169 : vector<4x256xf32>
    %cst_92 = arith.constant dense<0.000000e+00> : vector<4xf32>
    %171 = vector.multi_reduction <add>, %170, %cst_92 [1] : vector<4x256xf32> to vector<4xf32>
    %172 = vector.shape_cast %171 : vector<4xf32> to vector<4x1xf32>
    %cst_93 = arith.constant 2.560000e+02 : f32
    %173 = vector.broadcast %cst_93 : f32 to vector<4x1xf32>
    %174 = arith.divf %172, %173 : vector<4x1xf32>
    %175 = vector.broadcast %174 : vector<4x1xf32> to vector<4x256xf32>
    %176 = arith.subf %170, %175 : vector<4x256xf32>
    %177 = arith.mulf %176, %176 : vector<4x256xf32>
    %cst_94 = arith.constant dense<0.000000e+00> : vector<4xf32>
    %178 = vector.multi_reduction <add>, %177, %cst_94 [1] : vector<4x256xf32> to vector<4xf32>
    %179 = vector.shape_cast %178 : vector<4xf32> to vector<4x1xf32>
    %cst_95 = arith.constant 2.560000e+02 : f32
    %180 = vector.broadcast %cst_95 : f32 to vector<4x1xf32>
    %181 = arith.divf %179, %180 : vector<4x1xf32>
    %cst_96 = arith.constant 9.99999974E-6 : f32
    %182 = vector.broadcast %cst_96 : f32 to vector<4x1xf32>
    %183 = arith.addf %181, %182 : vector<4x1xf32>
    %184 = math.rsqrt %183 : vector<4x1xf32>
    %185 = vector.broadcast %184 : vector<4x1xf32> to vector<4x256xf32>
    %186 = arith.mulf %176, %185 : vector<4x256xf32>
    %187 = arith.addf %11, %186 : vector<4x256xf32>
    %c0_97 = arith.constant 0 : index
    %c0_98 = arith.constant 0 : index
    %c0_99 = arith.constant 0 : index
    %188 = vector.load %arg5[%c0_97, %c0_98, %c0_99] : memref<1x4x256xf32, #tpu.memory_space<vmem>>, vector<1x4x256xf32>
    %189 = vector.shape_cast %188 : vector<1x4x256xf32> to vector<4x256xf32>
    %190 = vector.shape_cast %187 : vector<4x256xf32> to vector<1x4x256xf32>
    tpu.vector_store %arg5[%c0_97, %c0_98, %c0_99], %190 {strides = array<i32>} : memref<1x4x256xf32, #tpu.memory_space<vmem>>, vector<1x4x256xf32>,
    return
  }
  func.func @transform_0(%arg0: i32) -> (i32, i32, i32) {
    %c0_i32 = arith.constant 0 : i32
    %c0_i32_0 = arith.constant 0 : i32
    %c0_i32_1 = arith.constant 0 : i32
    return %arg0, %c0_i32, %c0_i32_0 : i32, i32, i32
  }
  func.func @transform_1(%arg0: i32) -> (i32, i32, i32) {
    %c0_i32 = arith.constant 0 : i32
    %c0_i32_0 = arith.constant 0 : i32
    %c0_i32_1 = arith.constant 0 : i32
    %c0_i32_2 = arith.constant 0 : i32
    return %c0_i32, %c0_i32_0, %c0_i32_1 : i32, i32, i32
  }
  func.func @transform_2(%arg0: i32) -> (i32, i32, i32) {
    %c0_i32 = arith.constant 0 : i32
    %c0_i32_0 = arith.constant 0 : i32
    %c0_i32_1 = arith.constant 0 : i32
    %c0_i32_2 = arith.constant 0 : i32
    return %c0_i32, %c0_i32_0, %c0_i32_1 : i32, i32, i32
  }
  func.func @transform_3(%arg0: i32) -> (i32, i32) {
    %c0_i32 = arith.constant 0 : i32
    %c0_i32_0 = arith.constant 0 : i32
    %c0_i32_1 = arith.constant 0 : i32
    return %c0_i32, %c0_i32_0 : i32, i32
  }
  func.func @transform_4(%arg0: i32) -> (i32, i32, i32) {
    %c0_i32 = arith.constant 0 : i32
    %c0_i32_0 = arith.constant 0 : i32
    %c0_i32_1 = arith.constant 0 : i32
    return %arg0, %c0_i32, %c0_i32_0 : i32, i32, i32
  }
}

</mosaic_0001>

<bundles_post_ra>
// kernel: resblock.1
= control target key start
LH: loop header
LB: loop body
LE: loop exit
PB: predicated region body
PF: predicated region fallthrough
CT: control target
= control target key end

     0   :  { %s2139_s15 = smov 0   ;;  %s2536_s0 = inlined_call_operand.vmem [shape: f32[2,4,256], index: 0, kind: input, shape index: {}]   ;;  %s2537_s1 = inlined_call_operand.vmem [shape: f32[9,4,4], index: 1, kind: input, shape index: {}]   ;;  %s2538_s2 = inlined_call_operand.vmem [shape: f32[9,4,4], index: 2, kind: input, shape index: {}]   ;;  %s2539_s3 = inlined_call_operand.vmem [shape: s32[2,256], index: 3, kind: input, shape index: {}]   ;;  %s2540_s4 = inlined_call_operand.vmem [shape: f32[2,4,256], index: 4, kind: output, shape index: {}]  }
   0x1 LB: > { %s1997_s16 = sadd.s32 4294967295, %s2106_s15   ;;  %p2001_p0 = scmp.ge.s32.totalorder %s2106_s15, 1  ;;  %s2106_s15 = sphi %s2139_s15, %s14_s15  }
   0x2   : > { %p162_p1 = scmp.lt.s32.totalorder %s2106_s15, 3 }
   0x4   : > { %p163_p2 = pnand %p2001_p0, %p162_p1 }
   0x5   : > { %p188_p3 = scmp.lt.s32.totalorder (!%p163_p2), %s1997_s16, 1  ;;  %s2108_s21 = smov (!%p163_p2), 127  }
   0x6   : > { %166 = sbr.rel (%p163_p2) target bundleno = 1561 (0x619), region = 36  ;;  %s2109_s22 = smov (!%p163_p2), 1  }
   0x7   : > { %s2111_s25 = smov (!%p163_p2), 16   ;;  %s2112_s26 = smov (!%p163_p2), 112  }
   0xb   : > { %s2558_s16 = smov (!%p188_p3, %s1997_s16), 1  ;;  %v213_v0 = vlaneseq  ;;  %v2006_v4 = vld [vmem:[%s2539_s3 + $0x1] ss:$2 sm:$0x3]  ;;  %v2110_v6 = vmov 0   ;;  %v2113_v18 = vmov 0.0  }
   0xc   : > { %s2079_s17 = sshll.u32 %s2558_s16, 3  ;;  %vm204_vm0 = vcmp.eq.s32.totalorder %v2006_v4, 15  ;;  %v198_v9 = vld [vmem:[%s2539_s3] ss:$2 sm:$0x3]  ;;  %vm203_vm3 = vcmp.eq.s32.totalorder %v2006_v4, 0  ;;  %481 = vmatprep.mubr.f32.mxu1 %v2113_v18  ;;  %401 = vmatprep.mubr.f32.mxu0 %v2113_v18 }
   0xd   : > { %s192_s20 = scalar_lea.vmem %s2536_s0, %s2079_s17  ;;  %v227_v3 = vshrl.u32 %v213_v0, 7  ;;  %v278_v7 = vsel %vm204_vm0, 1, %v2110_v6  ;;  %vm201_vm1 = vcmp.eq.s32.totalorder %v198_v9, 0  ;;  %v2183_v12 = vand.u32 127, %v213_v0  ;;  %v2007_v55 = vld [vmem:[%s2537_s1 + $0x4] sm:$0xf]  ;;  %s197_s23 = scalar_lea.vmem %s2540_s4, %s2079_s17 }
   0xe   : > { %v2155_v1 = vld [vmem:[%s192_s20] sm:$0xff]  ;;  %v225_v11 = vsel %vm201_vm1, 1, %v2110_v6  ;;  %vm202_vm2 = vcmp.eq.s32.totalorder %v198_v9, 15  ;;  %v265_v21 = vsel %vm203_vm3, 1, %v2110_v6  ;;  %vm330_vm0 = vcmask 1043456  }
   0xf   : > { %218 = vrot.lane.b32.xlu1 %v2155_v1, %s2108_s21  ;;  %209 = vrot.lane.b32.xlu0 %v2155_v1, %s2109_s22  ;;  %v2163_v2 = vcombine.high %v2155_v1, %v2155_v1  ;;  %v228_v5 = vsub.s32 0, %v227_v3  ;;  %v232_v10 = vsub.s32 1, %v227_v3  ;;  %v238_v17 = vsel %vm202_vm2, 1, %v2110_v6  ;;  %v323_v4 = vld [vmem:[%s2537_s1] sm:$0xf] }
  0x10   : > { %vm222_vm4 = vcmp.lt.s32.totalorder %v2183_v12, 127  ;;  %vm215_vm5 = vcmp.lt.s32.totalorder %v2183_v12, 1  ;;  %vm255_vm8 = vcmp.lt.s32.totalorder %v2183_v12, 16  ;;  %vm262_vm9 = vcmp.lt.s32.totalorder %v2183_v12, 112  ;;  %v2061_v12 = vld [vmem:[%s2538_s2 + $0x14] sm:$0xf] }
  0x11   : > { %v282_v8 = vrot.slane %v278_v7, %v228_v5  ;;  %v229_v13 = vrot.slane %v225_v11, %v228_v5  ;;  %v233_v14 = vrot.slane %v225_v11, %v232_v10  ;;  %v242_v24 = vrot.slane %v238_v17, %v228_v5  ;;  %v2057_v43 = vld [vmem:[%s2538_s2 + $0x10] sm:$0xf]  ;;  %v2073_v44 = vld [vmem:[%s2538_s2 + $0x20] sm:$0xf] }
  0x12   : > { %v246_v31 = vrot.slane %v238_v17, %v232_v10  ;;  %v273_v32 = vrot.slane %v265_v21, %v232_v10  ;;  %v269_v33 = vrot.slane %v265_v21, %v228_v5  ;;  %v286_v34 = vrot.slane %v278_v7, %v232_v10  ;;  %v2018_v7 = vld [vmem:[%s2537_s1 + $0xc] sm:$0xf]  ;;  %v2014_v17 = vld [vmem:[%s2537_s1 + $0x8] sm:$0xf]  ;;  %v2026_v21 = vld [vmem:[%s2537_s1 + $0x14] sm:$0xf] }
  0x13   : > { %220 = vrot.lane.b32.xlu1 %v2163_v2, %s2108_s21  ;;  %211 = vrot.lane.b32.xlu0 %v2163_v2, %s2109_s22  ;;  %vm2189_vm6 = vcmp.eq.s32.totalorder %v229_v13, 1  ;;  %vm2193_vm7 = vcmp.eq.s32.totalorder %v233_v14, 1  ;;  %vm2213_vm10 = vcmp.eq.s32.totalorder %v242_v24, 1  ;;  %vm2221_vm12 = vcmp.eq.s32.totalorder %v282_v8, 1 }
  0x14   : > { %vm2217_vm11 = vcmp.eq.s32.totalorder %v246_v31, 1  ;;  %vm2225_vm13 = vcmp.eq.s32.totalorder %v273_v32, 1  ;;  %vm2237_vm14 = vcmp.eq.s32.totalorder %v269_v33, 1  ;;  %vm2241_vm15 = vcmp.eq.s32.totalorder %v286_v34, 1 }
  0x15   : > { %vm326_vm1 = vcmask 31744  }
  0x17   : > { %293 = vrot.lane.b32.xlu1 %v2163_v2, %s2111_s25  ;;  %291 = vrot.lane.b32.xlu0 %v2155_v1, %s2111_s25 }
  0x1b   : > { %299 = vrot.lane.b32.xlu1 %v2163_v2, %s2112_s26  ;;  %297 = vrot.lane.b32.xlu0 %v2155_v1, %s2112_s26 }
  0x81   : > { %v219_v15 = vpop.permute.xlu1 %218  ;;  %v210_v16 = vpop.permute.xlu0 %209 }
  0x85   : > { %v221_v22 = vpop.permute.xlu1 %220  ;;  %v212_v23 = vpop.permute.xlu0 %211 }
  0x86   : > { %v223_v25 = vsel %vm222_vm4, %v219_v15, %v221_v22  ;;  %v224_v26 = vsel %vm222_vm4, %v221_v22, %v219_v15  ;;  %v216_v27 = vsel %vm215_vm5, %v210_v16, %v212_v23  ;;  %v217_v28 = vsel %vm215_vm5, %v212_v23, %v210_v16  ;;  %v2022_v23 = vld [vmem:[%s2537_s1 + $0x10] sm:$0xf] }
  0x87   : > { %v236_v29 = vsel %vm2189_vm6, %v223_v25, %v217_v28  ;;  %v237_v30 = vsel %vm2193_vm7, %v224_v26, %v216_v27  ;;  %v249_v47 = vsel %vm2213_vm10, %v217_v28, %v223_v25  ;;  %v250_v48 = vsel %vm2217_vm11, %v216_v27, %v224_v26  ;;  %v2030_v26 = vld [vmem:[%s2537_s1 + $0x18] sm:$0xf]  ;;  %v2038_v28 = vld [vmem:[%s2537_s1 + $0x20] sm:$0xf] }
  0x88   : > { %251 = vrot.lane.b32.xlu0 %v236_v29, %s2111_s25  ;;  %253 = vrot.lane.b32.xlu1 %v237_v30, %s2111_s25 }
  0x89   : > { %v294_v35 = vpop.permute.xlu1 %293  ;;  %v292_v36 = vpop.permute.xlu0 %291 }
  0x8a   : > { %v295_v41 = vsel %vm255_vm8, %v292_v36, %v294_v35  ;;  %v2235_v42 = vsel %vm255_vm8, %v294_v35, %v292_v36 }
  0x8c   : > { %258 = vrot.lane.b32.xlu0 %v236_v29, %s2112_s26  ;;  %260 = vrot.lane.b32.xlu1 %v237_v30, %s2112_s26 }
  0x8d   : > { %v300_v45 = vpop.permute.xlu1 %299  ;;  %v298_v46 = vpop.permute.xlu0 %297 }
  0x8e   : > { %v301_v49 = vsel %vm262_vm9, %v298_v46, %v300_v45  ;;  %v302_v50 = vsel %vm262_vm9, %v300_v45, %v298_v46 }
  0x8f   : > { %v305_v51 = vsel %vm2221_vm12, %v2235_v42, %v301_v49  ;;  %v304_v52 = vsel %vm2225_vm13, %v302_v50, %v295_v41  ;;  %v303_v53 = vsel %vm2237_vm14, %v301_v49, %v2235_v42  ;;  %v306_v54 = vsel %vm2241_vm15, %v295_v41, %v302_v50 }
  0x90   : > { %307 = vrot.lane.b32.xlu0 %v249_v47, %s2111_s25  ;;  %309 = vrot.lane.b32.xlu1 %v250_v48, %s2111_s25 }
  0x91   : > { %2008 = vmatprep.subr.msk.mxu0 %vm330_vm0, %v304_v52 }
  0x92   : > { %2009 = vmatpush1.msk.msra.mxu0 %vm330_vm0, %v303_v53 }
  0x93   : > { %2010 = vmatmul.mubr.msk.f32.vlgmr.msra.gmra.mxu0 %vm326_vm1, %v2007_v55 }
  0x94   : > { %313 = vrot.lane.b32.xlu0 %v249_v47, %s2112_s26  ;;  %315 = vrot.lane.b32.xlu1 %v250_v48, %s2112_s26 }
  0x95   : > { %563 = vmatprep.mubr.f32.mxu0 %v2113_v18 }
  0xfa   : > { %v254_v56 = vpop.permute.xlu1 %253  ;;  %v252_v57 = vpop.permute.xlu0 %251 }
  0xfb   : > { %v256_v60 = vsel %vm255_vm8, %v252_v57, %v254_v56  ;;  %v257_v61 = vsel %vm255_vm8, %v254_v56, %v252_v57 }
  0xfe   : > { %v261_v58 = vpop.permute.xlu1 %260  ;;  %v259_v59 = vpop.permute.xlu0 %258 }
  0xff   : > { %v263_v62 = vsel %vm262_vm9, %v259_v59, %v261_v58  ;;  %v264_v63 = vsel %vm262_vm9, %v261_v58, %v259_v59 }
 0x100   : > { %v277_v0 = vsel %vm2225_vm13, %v264_v63, %v256_v60  ;;  %v276_v3 = vsel %vm2237_vm14, %v263_v62, %v257_v61  ;;  %v290_v22 = vsel %vm2241_vm15, %v256_v60, %v264_v63  ;;  %v289_v24 = vsel %vm2221_vm12, %v257_v61, %v263_v62 }
 0x101   : > { %2011 = vmatprep.subr.msk.mxu1 %vm330_vm0, %v277_v0 }
 0x102   : > { %v310_v5 = vpop.permute.xlu1 %309  ;;  %2012 = vmatpush1.msk.msra.mxu1 %vm330_vm0, %v276_v3  ;;  %v308_v6 = vpop.permute.xlu0 %307 }
 0x103   : > { %2013 = vmatmul.mubr.msk.f32.vlgmr.msra.gmra.mxu1 %vm326_vm1, %v323_v4  ;;  %2019 = vmatprep.subr.msk.mxu1 %vm330_vm0, %v237_v30  ;;  %v311_v10 = vsel %vm255_vm8, %v308_v6, %v310_v5  ;;  %v312_v11 = vsel %vm255_vm8, %v310_v5, %v308_v6 }
 0x104   : > { %2020 = vmatpush1.msk.msra.mxu1 %vm330_vm0, %v236_v29  ;;  %647 = vmatprep.mubr.f32.mxu1 %v2113_v18 }
 0x105   : > { %2027 = vmatprep.subr.msk.mxu1 %vm330_vm0, %v250_v48 }
 0x106   : > { %v316_v8 = vpop.permute.xlu1 %315  ;;  %v314_v9 = vpop.permute.xlu0 %313 }
 0x107   : > { %v317_v13 = vsel %vm262_vm9, %v314_v9, %v316_v8  ;;  %v318_v14 = vsel %vm262_vm9, %v316_v8, %v314_v9  ;;  %2021 = vmatmul.mubr.msk.f32.vlgmr.msra.gmra.mxu1 %vm326_vm1, %v2018_v7 }
 0x108   : > { %v319_v15 = vsel %vm2237_vm14, %v317_v13, %v312_v11  ;;  %2028 = vmatpush1.msk.msra.mxu1 %vm330_vm0, %v249_v47  ;;  %v320_v16 = vsel %vm2225_vm13, %v318_v14, %v311_v10  ;;  %813 = vmatprep.mubr.f32.mxu1 %v2113_v18  ;;  %v322_v25 = vsel %vm2241_vm15, %v311_v10, %v318_v14 }
 0x109   : > { %2035 = vmatprep.subr.msk.mxu1 %vm330_vm0, %v306_v54  ;;  %2015 = vmatprep.subr.msk.mxu0 %vm330_vm0, %v320_v16  ;;  %v321_v27 = vsel %vm2221_vm12, %v312_v11, %v317_v13 }
 0x10a   : > { %2016 = vmatpush1.msk.msra.mxu0 %vm330_vm0, %v319_v15 }
 0x10b   : > { %2017 = vmatmul.mubr.msk.f32.vlgmr.msra.gmra.mxu0 %vm326_vm1, %v2014_v17  ;;  %2023 = vmatprep.subr.msk.mxu0 %vm330_vm0, %v2163_v2  ;;  %v2034_v2 = vld [vmem:[%s2537_s1 + $0x1c] sm:$0xf] }
 0x10c   : > { %2029 = vmatmul.mubr.msk.f32.vlgmr.msra.gmra.mxu1 %vm326_vm1, %v2026_v21  ;;  %2024 = vmatpush1.msk.msra.mxu0 %vm330_vm0, %v2155_v1 }
 0x10d   : > { %2036 = vmatpush1.msk.msra.mxu1 %vm330_vm0, %v305_v51  ;;  %2031 = vmatprep.subr.msk.mxu0 %vm330_vm0, %v290_v22 }
 0x10e   : > { %729 = vmatprep.mubr.f32.mxu0 %v2113_v18  ;;  %981 = vmatprep.mubr.f32.mxu1 %v2113_v18 }
 0x10f   : > { %2025 = vmatmul.mubr.msk.f32.vlgmr.msra.gmra.mxu0 %vm326_vm1, %v2022_v23 }
 0x110   : > { %2032 = vmatpush1.msk.msra.mxu0 %vm330_vm0, %v289_v24  ;;  %897 = vmatprep.mubr.f32.mxu0 %v2113_v18 }
 0x111   : > { %2039 = vmatprep.subr.msk.mxu0 %vm330_vm0, %v322_v25  ;;  %2037 = vmatmul.mubr.msk.f32.vlgmr.msra.gmra.mxu1 %vm326_vm1, %v2034_v2 }
 0x112   : > { %1241 = vmatprep.mubr.f32.mxu1 %v2113_v18 }
 0x113   : > { %2033 = vmatmul.mubr.msk.f32.vlgmr.msra.gmra.mxu0 %vm326_vm1, %v2030_v26 }
 0x114   : > { %2040 = vmatpush1.msk.msra.mxu0 %vm330_vm0, %v321_v27  ;;  %1065 = vmatprep.mubr.f32.mxu0 %v2113_v18 }
 0x117   : > { %2041 = vmatmul.mubr.msk.f32.vlgmr.msra.gmra.mxu0 %vm326_vm1, %v2038_v28 }
 0x118   : > { %1321 = vmatprep.mubr.f32.mxu0 %v2113_v18 }
 0x153   : > { %v403_v30 = vpop.f32.mrf.mxu0 }
 0x155   : > { %v405_v33 = vpop.f32.mrf.mxu0 }
 0x1c3   : > { %v483_v29 = vpop.f32.mrf.mxu1 }
 0x1c4   : > { %v484_v35 = vadd.f32 %v483_v29, %v403_v30 }
 0x1c5   : > { %v485_v31 = vpop.f32.mrf.mxu1 }
 0x1c6   : > { %v486_v41 = vadd.f32 %v485_v31, %v405_v33 }
 0x1c7   : > { %v649_v32 = vpop.f32.mrf.mxu1 }
 0x1c9   : > { %v651_v34 = vpop.f32.mrf.mxu1 }
 0x1cb   : > { %v565_v36 = vpop.f32.mrf.mxu0 }
 0x1cc   : > { %v570_v42 = vadd.f32 %v565_v36, %v484_v35  ;;  %v815_v45 = vpop.f32.mrf.mxu1 }
 0x1cd   : > { %v567_v46 = vpop.f32.mrf.mxu0 }
 0x1ce   : > { %v654_v47 = vadd.f32 %v649_v32, %v570_v42  ;;  %v571_v48 = vadd.f32 %v567_v46, %v486_v41  ;;  %v817_v50 = vpop.f32.mrf.mxu1 }
 0x1cf   : > { %v731_v49 = vpop.f32.mrf.mxu0 }
 0x1d0   : > { %v655_v51 = vadd.f32 %v651_v34, %v571_v48  ;;  %v736_v52 = vadd.f32 %v731_v49, %v654_v47 }
 0x1d1   : > { %v733_v53 = vpop.f32.mrf.mxu0  ;;  %v983_v57 = vpop.f32.mrf.mxu1 }
 0x1d2   : > { %v820_v54 = vadd.f32 %v815_v45, %v736_v52  ;;  %v737_v55 = vadd.f32 %v733_v53, %v655_v51 }
 0x1d3   : > { %v899_v56 = vpop.f32.mrf.mxu0  ;;  %v985_v63 = vpop.f32.mrf.mxu1 }
 0x1d4   : > { %v821_v58 = vadd.f32 %v817_v50, %v737_v55  ;;  %v904_v59 = vadd.f32 %v899_v56, %v820_v54 }
 0x1d5   : > { %v901_v60 = vpop.f32.mrf.mxu0 }
 0x1d6   : > { %v988_v61 = vadd.f32 %v983_v57, %v904_v59  ;;  %v905_v62 = vadd.f32 %v901_v60, %v821_v58  ;;  %v2042_v58 = vld [vmem:[%s2538_s2 + $0x4] sm:$0xf] }
 0x1d7   : > { %v1067_v0 = vpop.f32.mrf.mxu0 }
 0x1d8   : > { %v989_v3 = vadd.f32 %v985_v63, %v905_v62  ;;  %v1072_v4 = vadd.f32 %v1067_v0, %v988_v61 }
 0x1d9   : > { %v1069_v5 = vpop.f32.mrf.mxu0 }
 0x1da   : > { %v1073_v6 = vadd.f32 %v1069_v5, %v989_v3  ;;  %v1074_v7 = vsel %vm330_vm0, %v1072_v4, 0.0 }
 0x1dc   : > { %v1075_v8 = vsel %vm330_vm0, %v1073_v6, 0.0 }
 0x1dd   : > { %v1076_v9 = vadd.f32 %v1075_v8, %v1074_v7  ;;  %v1165_v7 = vld [vmem:[%s2538_s2] sm:$0xf] }
 0x1df   : > { %1077 = vadd.xlane.f32.xlu0 %v1076_v9 }
 0x268   : > { %v1078_v10 = vpop.xlane.xlu0 %1077 }
 0x269   : > { %v1080_v11 = vmul.f32 0.00390625, %v1078_v10  ;;  %v2053_v10 = vld [vmem:[%s2538_s2 + $0xc] sm:$0xf] }
 0x26b   : > { %v1081_v13 = vsub.f32 %v1072_v4, %v1080_v11  ;;  %v1082_v14 = vsub.f32 %v1073_v6, %v1080_v11 }
 0x26d   : > { %v1083_v15 = vmul.f32 %v1081_v13, %v1081_v13  ;;  %v1084_v16 = vmul.f32 %v1082_v14, %v1082_v14 }
 0x26f   : > { %v1085_v17 = vsel %vm330_vm0, %v1083_v15, 0.0  ;;  %v1086_v21 = vsel %vm330_vm0, %v1084_v16, 0.0 }
 0x270   : > { %v1087_v22 = vadd.f32 %v1086_v21, %v1085_v17 }
 0x272   : > { %1088 = vadd.xlane.f32.xlu1 %v1087_v22 }
 0x2fb   : > { %v1089_v23 = vpop.xlane.xlu1 %1088 }
 0x2fc   : > { %v1090_v2 = vmul.f32 0.00390625, %v1089_v23  ;;  %v2049_v23 = vld [vmem:[%s2538_s2 + $0x8] sm:$0xf] }
 0x2fe   : > { %v1091_v24 = vadd.f32 1e-05, %v1090_v2  ;;  %v2069_v2 = vld [vmem:[%s2538_s2 + $0x1c] sm:$0xf] }
 0x300   : > { %2096 = vrsqrt.f32 %v1091_v24 }
 0x30d   : > { %v2097_v25 = vpop.eup %2096 }
 0x30e   : > { %v1094_v26 = vmul.f32 %v2097_v25, %v1082_v14  ;;  %v1093_v27 = vmul.f32 %v2097_v25, %v1081_v13 }
 0x310   : > { %vm1096_vm2 = vcmp.gt.f32.partialorder %v1094_v26, 0.0  ;;  %v1098_v28 = vmul.f32 0.2, %v1094_v26  ;;  %vm1095_vm3 = vcmp.gt.f32.partialorder %v1093_v27, 0.0  ;;  %v1097_v29 = vmul.f32 0.2, %v1093_v27 }
 0x312   : > { %v2368_v30 = vsel %vm1096_vm2, %v1094_v26, %v1098_v28  ;;  %v2370_v31 = vsel %vm1095_vm3, %v1093_v27, %v1097_v29  ;;  %v2065_v26 = vld [vmem:[%s2538_s2 + $0x18] sm:$0xf] }
 0x313   : > { %1103 = vrot.lane.b32.xlu1 %v2368_v30, %s2109_s22  ;;  %1101 = vrot.lane.b32.xlu0 %v2370_v31, %s2109_s22 }
 0x317   : > { %1109 = vrot.lane.b32.xlu1 %v2368_v30, %s2108_s21  ;;  %1107 = vrot.lane.b32.xlu0 %v2370_v31, %s2108_s21 }
 0x31b   : > { %1135 = vrot.lane.b32.xlu1 %v2368_v30, %s2111_s25  ;;  %1133 = vrot.lane.b32.xlu0 %v2370_v31, %s2111_s25 }
 0x31f   : > { %1141 = vrot.lane.b32.xlu1 %v2368_v30, %s2112_s26  ;;  %1139 = vrot.lane.b32.xlu0 %v2370_v31, %s2112_s26 }
 0x385   : > { %v1104_v32 = vpop.permute.xlu1 %1103  ;;  %v1102_v33 = vpop.permute.xlu0 %1101 }
 0x386   : > { %v1105_v36 = vsel %vm215_vm5, %v1102_v33, %v1104_v32  ;;  %v1106_v41 = vsel %vm215_vm5, %v1104_v32, %v1102_v33 }
 0x389   : > { %v1110_v34 = vpop.permute.xlu1 %1109  ;;  %v1108_v35 = vpop.permute.xlu0 %1107 }
 0x38a   : > { %v1111_v42 = vsel %vm222_vm4, %v1108_v35, %v1110_v34  ;;  %v1112_v45 = vsel %vm222_vm4, %v1110_v34, %v1108_v35 }
 0x38b   : > { %v1114_v46 = vsel %vm2193_vm7, %v1112_v45, %v1105_v36  ;;  %v1113_v47 = vsel %vm2189_vm6, %v1111_v42, %v1106_v41  ;;  %v1116_v52 = vsel %vm2217_vm11, %v1105_v36, %v1112_v45  ;;  %v1115_v20 = vsel %vm2213_vm10, %v1106_v41, %v1111_v42 }
 0x38c   : > { %1119 = vrot.lane.b32.xlu1 %v1114_v46, %s2111_s25  ;;  %1117 = vrot.lane.b32.xlu0 %v1113_v47, %s2111_s25 }
 0x38d   : > { %v1136_v48 = vpop.permute.xlu1 %1135  ;;  %v1134_v49 = vpop.permute.xlu0 %1133 }
 0x38e   : > { %v1137_v19 = vsel %vm255_vm8, %v1134_v49, %v1136_v48  ;;  %v1138_v53 = vsel %vm255_vm8, %v1136_v48, %v1134_v49 }
 0x390   : > { %1125 = vrot.lane.b32.xlu1 %v1114_v46, %s2112_s26  ;;  %1123 = vrot.lane.b32.xlu0 %v1113_v47, %s2112_s26 }
 0x391   : > { %v1142_v50 = vpop.permute.xlu1 %1141  ;;  %v1140_v51 = vpop.permute.xlu0 %1139 }
 0x392   : > { %v1143_v54 = vsel %vm262_vm9, %v1140_v51, %v1142_v50  ;;  %v1144_v55 = vsel %vm262_vm9, %v1142_v50, %v1140_v51 }
 0x393   : > { %v1145_v56 = vsel %vm2237_vm14, %v1143_v54, %v1138_v53  ;;  %v1147_v38 = vsel %vm2221_vm12, %v1138_v53, %v1143_v54  ;;  %v1146_v37 = vsel %vm2225_vm13, %v1144_v55, %v1137_v19  ;;  %v1148_v57 = vsel %vm2241_vm15, %v1137_v19, %v1144_v55 }
 0x394   : > { %1151 = vrot.lane.b32.xlu1 %v1116_v52, %s2111_s25  ;;  %1149 = vrot.lane.b32.xlu0 %v1115_v20, %s2111_s25 }
 0x395   : > { %2043 = vmatprep.subr.msk.mxu1 %vm330_vm0, %v1146_v37 }
 0x396   : > { %2044 = vmatpush1.msk.msra.mxu1 %vm330_vm0, %v1145_v56 }
 0x397   : > { %2045 = vmatmul.mubr.msk.f32.vlgmr.msra.gmra.mxu1 %vm326_vm1, %v2042_v58 }
 0x398   : > { %1157 = vrot.lane.b32.xlu1 %v1116_v52, %s2112_s26  ;;  %1155 = vrot.lane.b32.xlu0 %v1115_v20, %s2112_s26 }
 0x399   : > { %1403 = vmatprep.mubr.f32.mxu1 %v2113_v18 }
 0x3fe   : > { %v1120_v59 = vpop.permute.xlu1 %1119  ;;  %v1118_v60 = vpop.permute.xlu0 %1117 }
 0x3ff   : > { %v1121_v63 = vsel %vm255_vm8, %v1118_v60, %v1120_v59  ;;  %v1122_v0 = vsel %vm255_vm8, %v1120_v59, %v1118_v60 }
 0x402   : > { %v1126_v61 = vpop.permute.xlu1 %1125  ;;  %v1124_v62 = vpop.permute.xlu0 %1123 }
 0x403   : > { %v1127_v3 = vsel %vm262_vm9, %v1124_v62, %v1126_v61  ;;  %v1128_v4 = vsel %vm262_vm9, %v1126_v61, %v1124_v62 }
 0x404   : > { %v1129_v5 = vsel %vm2237_vm14, %v1127_v3, %v1122_v0  ;;  %v1130_v6 = vsel %vm2225_vm13, %v1128_v4, %v1121_v63  ;;  %v1132_v40 = vsel %vm2241_vm15, %v1121_v63, %v1128_v4  ;;  %v1131_v24 = vsel %vm2221_vm12, %v1122_v0, %v1127_v3 }
 0x405   : > { %2046 = vmatprep.subr.msk.mxu0 %vm330_vm0, %v1130_v6 }
 0x406   : > { %v1152_v8 = vpop.permute.xlu1 %1151  ;;  %2047 = vmatpush1.msk.msra.mxu0 %vm330_vm0, %v1129_v5  ;;  %v1150_v9 = vpop.permute.xlu0 %1149 }
 0x407   : > { %2048 = vmatmul.mubr.msk.f32.vlgmr.msra.gmra.mxu0 %vm326_vm1, %v1165_v7  ;;  %2054 = vmatprep.subr.msk.mxu0 %vm330_vm0, %v1114_v46  ;;  %v1153_v14 = vsel %vm255_vm8, %v1150_v9, %v1152_v8  ;;  %v1154_v15 = vsel %vm255_vm8, %v1152_v8, %v1150_v9 }
 0x408   : > { %2055 = vmatpush1.msk.msra.mxu0 %vm330_vm0, %v1113_v47  ;;  %1487 = vmatprep.mubr.f32.mxu0 %v2113_v18 }
 0x409   : > { %2062 = vmatprep.subr.msk.mxu0 %vm330_vm0, %v1116_v52 }
 0x40a   : > { %v1158_v11 = vpop.permute.xlu1 %1157  ;;  %v1156_v13 = vpop.permute.xlu0 %1155 }
 0x40b   : > { %v1159_v16 = vsel %vm262_vm9, %v1156_v13, %v1158_v11  ;;  %v1160_v17 = vsel %vm262_vm9, %v1158_v11, %v1156_v13  ;;  %2056 = vmatmul.mubr.msk.f32.vlgmr.msra.gmra.mxu0 %vm326_vm1, %v2053_v10 }
 0x40c   : > { %v1161_v21 = vsel %vm2237_vm14, %v1159_v16, %v1154_v15  ;;  %2063 = vmatpush1.msk.msra.mxu0 %vm330_vm0, %v1115_v20  ;;  %v1162_v22 = vsel %vm2225_vm13, %v1160_v17, %v1153_v14  ;;  %1655 = vmatprep.mubr.f32.mxu0 %v2113_v18  ;;  %v1164_v25 = vsel %vm2241_vm15, %v1153_v14, %v1160_v17 }
 0x40d   : > { %2070 = vmatprep.subr.msk.mxu0 %vm330_vm0, %v1148_v57  ;;  %2050 = vmatprep.subr.msk.mxu1 %vm330_vm0, %v1162_v22  ;;  %v1163_v27 = vsel %vm2221_vm12, %v1154_v15, %v1159_v16 }
 0x40e   : > { %2051 = vmatpush1.msk.msra.mxu1 %vm330_vm0, %v1161_v21 }
 0x40f   : > { %2052 = vmatmul.mubr.msk.f32.vlgmr.msra.gmra.mxu1 %vm326_vm1, %v2049_v23  ;;  %2058 = vmatprep.subr.msk.mxu1 %vm330_vm0, %v2368_v30 }
 0x410   : > { %2064 = vmatmul.mubr.msk.f32.vlgmr.msra.gmra.mxu0 %vm326_vm1, %v2061_v12  ;;  %2059 = vmatpush1.msk.msra.mxu1 %vm330_vm0, %v2370_v31 }
 0x411   : > { %2071 = vmatpush1.msk.msra.mxu0 %vm330_vm0, %v1147_v38  ;;  %2066 = vmatprep.subr.msk.mxu1 %vm330_vm0, %v1132_v40 }
 0x412   : > { %1571 = vmatprep.mubr.f32.mxu1 %v2113_v18  ;;  %1823 = vmatprep.mubr.f32.mxu0 %v2113_v18 }
 0x413   : > { %2060 = vmatmul.mubr.msk.f32.vlgmr.msra.gmra.mxu1 %vm326_vm1, %v2057_v43 }
 0x414   : > { %2067 = vmatpush1.msk.msra.mxu1 %vm330_vm0, %v1131_v24  ;;  %1739 = vmatprep.mubr.f32.mxu1 %v2113_v18 }
 0x415   : > { %2074 = vmatprep.subr.msk.mxu1 %vm330_vm0, %v1164_v25  ;;  %2072 = vmatmul.mubr.msk.f32.vlgmr.msra.gmra.mxu0 %vm326_vm1, %v2069_v2 }
 0x417   : > { %2068 = vmatmul.mubr.msk.f32.vlgmr.msra.gmra.mxu1 %vm326_vm1, %v2065_v26 }
 0x418   : > { %2075 = vmatpush1.msk.msra.mxu1 %vm330_vm0, %v1163_v27  ;;  %1907 = vmatprep.mubr.f32.mxu1 %v2113_v18 }
 0x41b   : > { %2076 = vmatmul.mubr.msk.f32.vlgmr.msra.gmra.mxu1 %vm326_vm1, %v2073_v44 }
 0x457   : > { %v1243_v29 = vpop.f32.mrf.mxu1 }
 0x459   : > { %v1245_v32 = vpop.f32.mrf.mxu1 }
 0x4c7   : > { %v1323_v28 = vpop.f32.mrf.mxu0 }
 0x4c8   : > { %v1324_v39 = vadd.f32 %v1323_v28, %v1243_v29 }
 0x4c9   : > { %v1325_v30 = vpop.f32.mrf.mxu0 }
 0x4ca   : > { %v1326_v35 = vadd.f32 %v1325_v30, %v1245_v32 }
 0x4cb   : > { %v1489_v31 = vpop.f32.mrf.mxu0 }
 0x4cd   : > { %v1491_v33 = vpop.f32.mrf.mxu0 }
 0x4cf   : > { %v1405_v34 = vpop.f32.mrf.mxu1 }
 0x4d0   : > { %v1410_v36 = vadd.f32 %v1405_v34, %v1324_v39  ;;  %v1657_v41 = vpop.f32.mrf.mxu0 }
 0x4d1   : > { %v1407_v42 = vpop.f32.mrf.mxu1 }
 0x4d2   : > { %v1411_v45 = vadd.f32 %v1407_v42, %v1326_v35  ;;  %v1494_v18 = vadd.f32 %v1489_v31, %v1410_v36  ;;  %v1659_v47 = vpop.f32.mrf.mxu0 }
 0x4d3   : > { %v1573_v46 = vpop.f32.mrf.mxu1 }
 0x4d4   : > { %v1495_v48 = vadd.f32 %v1491_v33, %v1411_v45  ;;  %v1578_v49 = vadd.f32 %v1573_v46, %v1494_v18 }
 0x4d5   : > { %v1575_v50 = vpop.f32.mrf.mxu1  ;;  %v1825_v19 = vpop.f32.mrf.mxu0 }
 0x4d6   : > { %v1579_v51 = vadd.f32 %v1575_v50, %v1495_v48  ;;  %v1662_v52 = vadd.f32 %v1657_v41, %v1578_v49 }
 0x4d7   : > { %v1741_v20 = vpop.f32.mrf.mxu1  ;;  %v1827_v37 = vpop.f32.mrf.mxu0 }
 0x4d8   : > { %v1663_v53 = vadd.f32 %v1659_v47, %v1579_v51  ;;  %v1746_v54 = vadd.f32 %v1741_v20, %v1662_v52 }
 0x4d9   : > { %v1743_v55 = vpop.f32.mrf.mxu1 }
 0x4da   : > { %v1747_v56 = vadd.f32 %v1743_v55, %v1663_v53  ;;  %v1830_v38 = vadd.f32 %v1825_v19, %v1746_v54 }
 0x4db   : > { %v1909_v57 = vpop.f32.mrf.mxu1 }
 0x4dc   : > { %v1831_v58 = vadd.f32 %v1827_v37, %v1747_v56  ;;  %v1914_v59 = vadd.f32 %v1909_v57, %v1830_v38 }
 0x4dd   : > { %v1911_v60 = vpop.f32.mrf.mxu1 }
 0x4de   : > { %v1915_v61 = vadd.f32 %v1911_v60, %v1831_v58  ;;  %v1916_v62 = vsel %vm330_vm0, %v1914_v59, 0.0 }
 0x4e0   : > { %v1917_v63 = vsel %vm330_vm0, %v1915_v61, 0.0 }
 0x4e1   : > { %v1918_v0 = vadd.f32 %v1917_v63, %v1916_v62 }
 0x4e3   : > { %1919 = vadd.xlane.f32.xlu0 %v1918_v0 }
 0x56c   : > { %v1920_v3 = vpop.xlane.xlu0 %1919 }
 0x56d   : > { %v1921_v4 = vmul.f32 0.00390625, %v1920_v3 }
 0x56f   : > { %v1922_v5 = vsub.f32 %v1914_v59, %v1921_v4  ;;  %v1923_v6 = vsub.f32 %v1915_v61, %v1921_v4 }
 0x571   : > { %v1924_v7 = vmul.f32 %v1922_v5, %v1922_v5  ;;  %v1925_v8 = vmul.f32 %v1923_v6, %v1923_v6 }
 0x573   : > { %v1926_v9 = vsel %vm330_vm0, %v1924_v7, 0.0  ;;  %v1927_v10 = vsel %vm330_vm0, %v1925_v8, 0.0 }
 0x574   : > { %v1928_v11 = vadd.f32 %v1927_v10, %v1926_v9 }
 0x576   : > { %1929 = vadd.xlane.f32.xlu1 %v1928_v11 }
 0x5ff   : > { %v1930_v13 = vpop.xlane.xlu1 %1929 }
 0x600   : > { %v1931_v14 = vmul.f32 0.00390625, %v1930_v13 }
 0x602   : > { %v1932_v15 = vadd.f32 1e-05, %v1931_v14 }
 0x604   : > { %2098 = vrsqrt.f32 %v1932_v15 }
 0x611   : > { %v2099_v16 = vpop.eup %2098 }
 0x612   : > { %v1934_v17 = vmul.f32 %v2099_v16, %v1922_v5  ;;  %v1935_v21 = vmul.f32 %v2099_v16, %v1923_v6 }
 0x614   : > { %v1938_v22 = vcombine.low %v1934_v17, %v1935_v21 }
 0x616   : > { %v1940_v23 = vadd.f32 %v1938_v22, %v2155_v1 }
 0x618   : > { %1941 = vst [vmem:[%s197_s23] sm:$0xff] %v1940_v23 }
 0x619 PF: > { %s14_s15 = sadd.s32 1, %s2106_s15  }
 0x61a   : > { %p11_p4 = scmp.ge.s32.totalorder %s14_s15, 4  }
 0x61c   :  { %13 = sbr.rel (!%p11_p4) target bundleno = 1 (0x1), region = 83 }

</bundles_post_ra>
